<compile_context>
chip_gen: v7x
topology: tpu7x:2x2x1
jax: 0.10.0
libtpu: 0.0.40
codegen_flags: <defaults>
</compile_context>

<pallas_src>
import functools

import jax
import jax.numpy as jnp
from jax.experimental import pallas as pl
from jax.experimental.pallas import tpu as pltpu

IN_F = 6
HID_F = 4
OUT_F = 2


def meta_learner_kernel(w1_ref, b1_ref, w2_ref, b2_ref, x_ref, o_ref):
    """w*/b* live in SMEM (scalar reads); x_ref is a [6, TB] VMEM tile; o_ref is [2, TB]."""
    x = x_ref[...]  # [6, TB] float32, batch on the lane axis

    # fc1 + ReLU: h_j = relu(sum_k w1[k, j] * x[k, :] + b1[j])  -- unrolled VPU MACs.
    h = []
    for j in range(HID_F):
        acc = x[0:1, :] * w1_ref[0, j]
        for k in range(1, IN_F):
            acc = acc + x[k:k + 1, :] * w1_ref[k, j]
        h.append(jnp.maximum(acc + b1_ref[j], 0.0))  # [1, TB]

    # fc2: logits_j = sum_k w2[k, j] * h_k + b2[j]
    logits = []
    for j in range(OUT_F):
        acc = h[0] * w2_ref[0, j]
        for k in range(1, HID_F):
            acc = acc + h[k] * w2_ref[k, j]
        logits.append(acc + b2_ref[j])  # [1, TB]

    # Numerically-stable 2-class softmax (elementwise max, no cross-lane reduction).
    m = jnp.maximum(logits[0], logits[1])
    e0 = jnp.exp(logits[0] - m)
    e1 = jnp.exp(logits[1] - m)
    inv = 1.0 / (e0 + e1)
    o_ref[0:1, :] = (e0 * inv).astype(o_ref.dtype)
    o_ref[1:2, :] = (e1 * inv).astype(o_ref.dtype)


@functools.partial(jax.jit, static_argnames=("tb",))
def meta_learner_forward(x, w1_t, b1, w2_t, b2, *, tb=1024):
    """x: [B, 6] f32; w1_t: [6, 4]; b1: [4]; w2_t: [4, 2]; b2: [2]. Returns [B, 2]."""
    B = x.shape[0]
    x_t = jnp.transpose(x)  # [6, B] -- batch on the lane axis (layout plumbing in wrapper)

    if B > tb:
        tile = max(128, (tb // 128) * 128)  # lane-aligned batch tile
    else:
        tile = B  # single full-extent block (legal for any B)
    n_tiles = pl.cdiv(B, tile)
    b_pad = n_tiles * tile
    if b_pad != B:
        # Zero-pad so every grid step sees a full, well-defined tile (no ragged tail).
        x_t = jnp.pad(x_t, ((0, 0), (0, b_pad - B)))

    smem_spec = pl.BlockSpec(memory_space=pltpu.MemorySpace.SMEM)

    out_t = pl.pallas_call(
        meta_learner_kernel,
        out_shape=jax.ShapeDtypeStruct((OUT_F, b_pad), jnp.float32),
        grid=(n_tiles,),
        in_specs=[
            smem_spec,  # w1_t [6, 4]
            smem_spec,  # b1   [4]
            smem_spec,  # w2_t [4, 2]
            smem_spec,  # b2   [2]
            pl.BlockSpec((IN_F, tile), lambda i: (0, i)),
        ],
        out_specs=pl.BlockSpec((OUT_F, tile), lambda i: (0, i)),
        compiler_params=pltpu.CompilerParams(
            dimension_semantics=("parallel",),
            vmem_limit_bytes=32 * 1024 * 1024,
        ),
        cost_estimate=pl.CostEstimate(
            flops=80 * b_pad,
            transcendentals=2 * b_pad,
            bytes_accessed=(IN_F + OUT_F) * 4 * b_pad,
        ),
    )(w1_t, b1, w2_t, b2, x_t)

    return jnp.transpose(out_t[:, :B])  # [B, 2]


def init_params(key):
    """Deterministic init mirroring nn.Linear shapes.

    PyTorch stores Linear weight as [out, in] and computes x @ W.T + b; we store the
    transpose [in, out] directly so the kernel MACs index weights as w[in, out].
    """
    k1, k2, k3, k4 = jax.random.split(key, 4)
    bound1 = 1.0 / jnp.sqrt(6.0)
    w1_t = jax.random.uniform(k1, (IN_F, HID_F), jnp.float32, -bound1, bound1)
    b1 = jax.random.uniform(k2, (HID_F,), jnp.float32, -bound1, bound1)
    bound2 = 1.0 / jnp.sqrt(4.0)
    w2_t = jax.random.uniform(k3, (HID_F, OUT_F), jnp.float32, -bound2, bound2)
    b2 = jax.random.uniform(k4, (OUT_F,), jnp.float32, -bound2, bound2)
    return w1_t, b1, w2_t, b2


def reference_forward(x, w1_t, b1, w2_t, b2):
    hi = jax.lax.Precision.HIGHEST
    h = jnp.maximum(jnp.dot(x, w1_t, precision=hi) + b1, 0.0)
    logits = jnp.dot(h, w2_t, precision=hi) + b2
    return jax.nn.softmax(logits, axis=1)


if __name__ == "__main__":
    key = jax.random.PRNGKey(0)
    k_params, k_x1, k_x2 = jax.random.split(key, 3)
    w1_t, b1, w2_t, b2 = init_params(k_params)

    # Small-batch check (single full-extent tile), shapes consistent with the module.
    batch = 8
    x = jax.random.normal(k_x1, (batch, IN_F), jnp.float32)
    out = jax.block_until_ready(meta_learner_forward(x, w1_t, b1, w2_t, b2))
    ref = reference_forward(x, w1_t, b1, w2_t, b2)
    assert out.shape == (batch, OUT_F)
    assert jnp.allclose(out, ref, atol=1e-5, rtol=1e-5), "mismatch vs reference (small)"
    assert jnp.allclose(jnp.sum(out, axis=1), jnp.ones((batch,)), atol=1e-5)

    # Multi-tile check: exercises the pipelined grid + padded tail path.
    x_big = jax.random.normal(k_x2, (1000, IN_F), jnp.float32)
    out_big = jax.block_until_ready(
        meta_learner_forward(x_big, w1_t, b1, w2_t, b2, tb=256))
    ref_big = reference_forward(x_big, w1_t, b1, w2_t, b2)
    assert out_big.shape == (1000, OUT_F)
    assert jnp.allclose(out_big, ref_big, atol=1e-5, rtol=1e-5), "mismatch vs reference (tiled)"

    print("KERNEL_OK")
</pallas_src>

<mosaic_0001>
module attributes {stable_mosaic.version = 11 : i64} {
  func.func @meta_learner_kernel(%arg0: i32, %arg1: memref<6x4xf32, #tpu.memory_space<smem>>, %arg2: memref<4xf32, #tpu.memory_space<smem>>, %arg3: memref<4x2xf32, #tpu.memory_space<smem>>, %arg4: memref<2xf32, #tpu.memory_space<smem>>, %arg5: memref<6x8xf32, #tpu.memory_space<vmem>>, %arg6: memref<2x8xf32, #tpu.memory_space<vmem>>) attributes {dimension_semantics = [#tpu.dimension_semantics<parallel>], iteration_bounds = array<i64: 1>, scalar_prefetch = 0 : i64, scratch_operands = 0 : i64, tpu.core_type = #tpu.core_type<tc>, window_params = [{transform_indices = @transform_0, window_bounds = array<i64: 6, 4>}, {transform_indices = @transform_1, window_bounds = array<i64: 4>}, {transform_indices = @transform_2, window_bounds = array<i64: 4, 2>}, {transform_indices = @transform_3, window_bounds = array<i64: 2>}, {transform_indices = @transform_4, window_bounds = array<i64: 6, 8>}, {transform_indices = @transform_5, window_bounds = array<i64: 2, 8>}]} {
    %c0 = arith.constant 0 : index
    %c0_0 = arith.constant 0 : index
    %0 = vector.load %arg5[%c0, %c0_0] : memref<6x8xf32, #tpu.memory_space<vmem>>, vector<6x8xf32>
    %1 = vector.extract_strided_slice %0 {offsets = [0, 0], sizes = [1, 8], strides = [1, 1]} : vector<6x8xf32> to vector<1x8xf32>
    %c0_1 = arith.constant 0 : index
    %c0_2 = arith.constant 0 : index
    %2 = memref.load %arg1[%c0_1, %c0_2] : memref<6x4xf32, #tpu.memory_space<smem>>
    %3 = vector.broadcast %2 : f32 to vector<1x8xf32>
    %4 = arith.mulf %1, %3 : vector<1x8xf32>
    %5 = vector.extract_strided_slice %0 {offsets = [1, 0], sizes = [1, 8], strides = [1, 1]} : vector<6x8xf32> to vector<1x8xf32>
    %c1 = arith.constant 1 : index
    %c0_3 = arith.constant 0 : index
    %6 = memref.load %arg1[%c1, %c0_3] : memref<6x4xf32, #tpu.memory_space<smem>>
    %7 = vector.broadcast %6 : f32 to vector<1x8xf32>
    %8 = arith.mulf %5, %7 : vector<1x8xf32>
    %9 = arith.addf %4, %8 : vector<1x8xf32>
    %10 = vector.extract_strided_slice %0 {offsets = [2, 0], sizes = [1, 8], strides = [1, 1]} : vector<6x8xf32> to vector<1x8xf32>
    %c2 = arith.constant 2 : index
    %c0_4 = arith.constant 0 : index
    %11 = memref.load %arg1[%c2, %c0_4] : memref<6x4xf32, #tpu.memory_space<smem>>
    %12 = vector.broadcast %11 : f32 to vector<1x8xf32>
    %13 = arith.mulf %10, %12 : vector<1x8xf32>
    %14 = arith.addf %9, %13 : vector<1x8xf32>
    %15 = vector.extract_strided_slice %0 {offsets = [3, 0], sizes = [1, 8], strides = [1, 1]} : vector<6x8xf32> to vector<1x8xf32>
    %c3 = arith.constant 3 : index
    %c0_5 = arith.constant 0 : index
    %16 = memref.load %arg1[%c3, %c0_5] : memref<6x4xf32, #tpu.memory_space<smem>>
    %17 = vector.broadcast %16 : f32 to vector<1x8xf32>
    %18 = arith.mulf %15, %17 : vector<1x8xf32>
    %19 = arith.addf %14, %18 : vector<1x8xf32>
    %20 = vector.extract_strided_slice %0 {offsets = [4, 0], sizes = [1, 8], strides = [1, 1]} : vector<6x8xf32> to vector<1x8xf32>
    %c4 = arith.constant 4 : index
    %c0_6 = arith.constant 0 : index
    %21 = memref.load %arg1[%c4, %c0_6] : memref<6x4xf32, #tpu.memory_space<smem>>
    %22 = vector.broadcast %21 : f32 to vector<1x8xf32>
    %23 = arith.mulf %20, %22 : vector<1x8xf32>
    %24 = arith.addf %19, %23 : vector<1x8xf32>
    %25 = vector.extract_strided_slice %0 {offsets = [5, 0], sizes = [1, 8], strides = [1, 1]} : vector<6x8xf32> to vector<1x8xf32>
    %c5 = arith.constant 5 : index
    %c0_7 = arith.constant 0 : index
    %26 = memref.load %arg1[%c5, %c0_7] : memref<6x4xf32, #tpu.memory_space<smem>>
    %27 = vector.broadcast %26 : f32 to vector<1x8xf32>
    %28 = arith.mulf %25, %27 : vector<1x8xf32>
    %29 = arith.addf %24, %28 : vector<1x8xf32>
    %c0_8 = arith.constant 0 : index
    %30 = memref.load %arg2[%c0_8] : memref<4xf32, #tpu.memory_space<smem>>
    %31 = vector.broadcast %30 : f32 to vector<1x8xf32>
    %32 = arith.addf %29, %31 : vector<1x8xf32>
    %cst = arith.constant 0.000000e+00 : f32
    %33 = vector.broadcast %cst : f32 to vector<1x8xf32>
    %34 = arith.maximumf %32, %33 : vector<1x8xf32>
    %35 = vector.extract_strided_slice %0 {offsets = [0, 0], sizes = [1, 8], strides = [1, 1]} : vector<6x8xf32> to vector<1x8xf32>
    %c0_9 = arith.constant 0 : index
    %c1_10 = arith.constant 1 : index
    %36 = memref.load %arg1[%c0_9, %c1_10] : memref<6x4xf32, #tpu.memory_space<smem>>
    %37 = vector.broadcast %36 : f32 to vector<1x8xf32>
    %38 = arith.mulf %35, %37 : vector<1x8xf32>
    %39 = vector.extract_strided_slice %0 {offsets = [1, 0], sizes = [1, 8], strides = [1, 1]} : vector<6x8xf32> to vector<1x8xf32>
    %c1_11 = arith.constant 1 : index
    %c1_12 = arith.constant 1 : index
    %40 = memref.load %arg1[%c1_11, %c1_12] : memref<6x4xf32, #tpu.memory_space<smem>>
    %41 = vector.broadcast %40 : f32 to vector<1x8xf32>
    %42 = arith.mulf %39, %41 : vector<1x8xf32>
    %43 = arith.addf %38, %42 : vector<1x8xf32>
    %44 = vector.extract_strided_slice %0 {offsets = [2, 0], sizes = [1, 8], strides = [1, 1]} : vector<6x8xf32> to vector<1x8xf32>
    %c2_13 = arith.constant 2 : index
    %c1_14 = arith.constant 1 : index
    %45 = memref.load %arg1[%c2_13, %c1_14] : memref<6x4xf32, #tpu.memory_space<smem>>
    %46 = vector.broadcast %45 : f32 to vector<1x8xf32>
    %47 = arith.mulf %44, %46 : vector<1x8xf32>
    %48 = arith.addf %43, %47 : vector<1x8xf32>
    %49 = vector.extract_strided_slice %0 {offsets = [3, 0], sizes = [1, 8], strides = [1, 1]} : vector<6x8xf32> to vector<1x8xf32>
    %c3_15 = arith.constant 3 : index
    %c1_16 = arith.constant 1 : index
    %50 = memref.load %arg1[%c3_15, %c1_16] : memref<6x4xf32, #tpu.memory_space<smem>>
    %51 = vector.broadcast %50 : f32 to vector<1x8xf32>
    %52 = arith.mulf %49, %51 : vector<1x8xf32>
    %53 = arith.addf %48, %52 : vector<1x8xf32>
    %54 = vector.extract_strided_slice %0 {offsets = [4, 0], sizes = [1, 8], strides = [1, 1]} : vector<6x8xf32> to vector<1x8xf32>
    %c4_17 = arith.constant 4 : index
    %c1_18 = arith.constant 1 : index
    %55 = memref.load %arg1[%c4_17, %c1_18] : memref<6x4xf32, #tpu.memory_space<smem>>
    %56 = vector.broadcast %55 : f32 to vector<1x8xf32>
    %57 = arith.mulf %54, %56 : vector<1x8xf32>
    %58 = arith.addf %53, %57 : vector<1x8xf32>
    %59 = vector.extract_strided_slice %0 {offsets = [5, 0], sizes = [1, 8], strides = [1, 1]} : vector<6x8xf32> to vector<1x8xf32>
    %c5_19 = arith.constant 5 : index
    %c1_20 = arith.constant 1 : index
    %60 = memref.load %arg1[%c5_19, %c1_20] : memref<6x4xf32, #tpu.memory_space<smem>>
    %61 = vector.broadcast %60 : f32 to vector<1x8xf32>
    %62 = arith.mulf %59, %61 : vector<1x8xf32>
    %63 = arith.addf %58, %62 : vector<1x8xf32>
    %c1_21 = arith.constant 1 : index
    %64 = memref.load %arg2[%c1_21] : memref<4xf32, #tpu.memory_space<smem>>
    %65 = vector.broadcast %64 : f32 to vector<1x8xf32>
    %66 = arith.addf %63, %65 : vector<1x8xf32>
    %cst_22 = arith.constant 0.000000e+00 : f32
    %67 = vector.broadcast %cst_22 : f32 to vector<1x8xf32>
    %68 = arith.maximumf %66, %67 : vector<1x8xf32>
    %69 = vector.extract_strided_slice %0 {offsets = [0, 0], sizes = [1, 8], strides = [1, 1]} : vector<6x8xf32> to vector<1x8xf32>
    %c0_23 = arith.constant 0 : index
    %c2_24 = arith.constant 2 : index
    %70 = memref.load %arg1[%c0_23, %c2_24] : memref<6x4xf32, #tpu.memory_space<smem>>
    %71 = vector.broadcast %70 : f32 to vector<1x8xf32>
    %72 = arith.mulf %69, %71 : vector<1x8xf32>
    %73 = vector.extract_strided_slice %0 {offsets = [1, 0], sizes = [1, 8], strides = [1, 1]} : vector<6x8xf32> to vector<1x8xf32>
    %c1_25 = arith.constant 1 : index
    %c2_26 = arith.constant 2 : index
    %74 = memref.load %arg1[%c1_25, %c2_26] : memref<6x4xf32, #tpu.memory_space<smem>>
    %75 = vector.broadcast %74 : f32 to vector<1x8xf32>
    %76 = arith.mulf %73, %75 : vector<1x8xf32>
    %77 = arith.addf %72, %76 : vector<1x8xf32>
    %78 = vector.extract_strided_slice %0 {offsets = [2, 0], sizes = [1, 8], strides = [1, 1]} : vector<6x8xf32> to vector<1x8xf32>
    %c2_27 = arith.constant 2 : index
    %c2_28 = arith.constant 2 : index
    %79 = memref.load %arg1[%c2_27, %c2_28] : memref<6x4xf32, #tpu.memory_space<smem>>
    %80 = vector.broadcast %79 : f32 to vector<1x8xf32>
    %81 = arith.mulf %78, %80 : vector<1x8xf32>
    %82 = arith.addf %77, %81 : vector<1x8xf32>
    %83 = vector.extract_strided_slice %0 {offsets = [3, 0], sizes = [1, 8], strides = [1, 1]} : vector<6x8xf32> to vector<1x8xf32>
    %c3_29 = arith.constant 3 : index
    %c2_30 = arith.constant 2 : index
    %84 = memref.load %arg1[%c3_29, %c2_30] : memref<6x4xf32, #tpu.memory_space<smem>>
    %85 = vector.broadcast %84 : f32 to vector<1x8xf32>
    %86 = arith.mulf %83, %85 : vector<1x8xf32>
    %87 = arith.addf %82, %86 : vector<1x8xf32>
    %88 = vector.extract_strided_slice %0 {offsets = [4, 0], sizes = [1, 8], strides = [1, 1]} : vector<6x8xf32> to vector<1x8xf32>
    %c4_31 = arith.constant 4 : index
    %c2_32 = arith.constant 2 : index
    %89 = memref.load %arg1[%c4_31, %c2_32] : memref<6x4xf32, #tpu.memory_space<smem>>
    %90 = vector.broadcast %89 : f32 to vector<1x8xf32>
    %91 = arith.mulf %88, %90 : vector<1x8xf32>
    %92 = arith.addf %87, %91 : vector<1x8xf32>
    %93 = vector.extract_strided_slice %0 {offsets = [5, 0], sizes = [1, 8], strides = [1, 1]} : vector<6x8xf32> to vector<1x8xf32>
    %c5_33 = arith.constant 5 : index
    %c2_34 = arith.constant 2 : index
    %94 = memref.load %arg1[%c5_33, %c2_34] : memref<6x4xf32, #tpu.memory_space<smem>>
    %95 = vector.broadcast %94 : f32 to vector<1x8xf32>
    %96 = arith.mulf %93, %95 : vector<1x8xf32>
    %97 = arith.addf %92, %96 : vector<1x8xf32>
    %c2_35 = arith.constant 2 : index
    %98 = memref.load %arg2[%c2_35] : memref<4xf32, #tpu.memory_space<smem>>
    %99 = vector.broadcast %98 : f32 to vector<1x8xf32>
    %100 = arith.addf %97, %99 : vector<1x8xf32>
    %cst_36 = arith.constant 0.000000e+00 : f32
    %101 = vector.broadcast %cst_36 : f32 to vector<1x8xf32>
    %102 = arith.maximumf %100, %101 : vector<1x8xf32>
    %103 = vector.extract_strided_slice %0 {offsets = [0, 0], sizes = [1, 8], strides = [1, 1]} : vector<6x8xf32> to vector<1x8xf32>
    %c0_37 = arith.constant 0 : index
    %c3_38 = arith.constant 3 : index
    %104 = memref.load %arg1[%c0_37, %c3_38] : memref<6x4xf32, #tpu.memory_space<smem>>
    %105 = vector.broadcast %104 : f32 to vector<1x8xf32>
    %106 = arith.mulf %103, %105 : vector<1x8xf32>
    %107 = vector.extract_strided_slice %0 {offsets = [1, 0], sizes = [1, 8], strides = [1, 1]} : vector<6x8xf32> to vector<1x8xf32>
    %c1_39 = arith.constant 1 : index
    %c3_40 = arith.constant 3 : index
    %108 = memref.load %arg1[%c1_39, %c3_40] : memref<6x4xf32, #tpu.memory_space<smem>>
    %109 = vector.broadcast %108 : f32 to vector<1x8xf32>
    %110 = arith.mulf %107, %109 : vector<1x8xf32>
    %111 = arith.addf %106, %110 : vector<1x8xf32>
    %112 = vector.extract_strided_slice %0 {offsets = [2, 0], sizes = [1, 8], strides = [1, 1]} : vector<6x8xf32> to vector<1x8xf32>
    %c2_41 = arith.constant 2 : index
    %c3_42 = arith.constant 3 : index
    %113 = memref.load %arg1[%c2_41, %c3_42] : memref<6x4xf32, #tpu.memory_space<smem>>
    %114 = vector.broadcast %113 : f32 to vector<1x8xf32>
    %115 = arith.mulf %112, %114 : vector<1x8xf32>
    %116 = arith.addf %111, %115 : vector<1x8xf32>
    %117 = vector.extract_strided_slice %0 {offsets = [3, 0], sizes = [1, 8], strides = [1, 1]} : vector<6x8xf32> to vector<1x8xf32>
    %c3_43 = arith.constant 3 : index
    %c3_44 = arith.constant 3 : index
    %118 = memref.load %arg1[%c3_43, %c3_44] : memref<6x4xf32, #tpu.memory_space<smem>>
    %119 = vector.broadcast %118 : f32 to vector<1x8xf32>
    %120 = arith.mulf %117, %119 : vector<1x8xf32>
    %121 = arith.addf %116, %120 : vector<1x8xf32>
    %122 = vector.extract_strided_slice %0 {offsets = [4, 0], sizes = [1, 8], strides = [1, 1]} : vector<6x8xf32> to vector<1x8xf32>
    %c4_45 = arith.constant 4 : index
    %c3_46 = arith.constant 3 : index
    %123 = memref.load %arg1[%c4_45, %c3_46] : memref<6x4xf32, #tpu.memory_space<smem>>
    %124 = vector.broadcast %123 : f32 to vector<1x8xf32>
    %125 = arith.mulf %122, %124 : vector<1x8xf32>
    %126 = arith.addf %121, %125 : vector<1x8xf32>
    %127 = vector.extract_strided_slice %0 {offsets = [5, 0], sizes = [1, 8], strides = [1, 1]} : vector<6x8xf32> to vector<1x8xf32>
    %c5_47 = arith.constant 5 : index
    %c3_48 = arith.constant 3 : index
    %128 = memref.load %arg1[%c5_47, %c3_48] : memref<6x4xf32, #tpu.memory_space<smem>>
    %129 = vector.broadcast %128 : f32 to vector<1x8xf32>
    %130 = arith.mulf %127, %129 : vector<1x8xf32>
    %131 = arith.addf %126, %130 : vector<1x8xf32>
    %c3_49 = arith.constant 3 : index
    %132 = memref.load %arg2[%c3_49] : memref<4xf32, #tpu.memory_space<smem>>
    %133 = vector.broadcast %132 : f32 to vector<1x8xf32>
    %134 = arith.addf %131, %133 : vector<1x8xf32>
    %cst_50 = arith.constant 0.000000e+00 : f32
    %135 = vector.broadcast %cst_50 : f32 to vector<1x8xf32>
    %136 = arith.maximumf %134, %135 : vector<1x8xf32>
    %c0_51 = arith.constant 0 : index
    %c0_52 = arith.constant 0 : index
    %137 = memref.load %arg3[%c0_51, %c0_52] : memref<4x2xf32, #tpu.memory_space<smem>>
    %138 = vector.broadcast %137 : f32 to vector<1x8xf32>
    %139 = arith.mulf %34, %138 : vector<1x8xf32>
    %c1_53 = arith.constant 1 : index
    %c0_54 = arith.constant 0 : index
    %140 = memref.load %arg3[%c1_53, %c0_54] : memref<4x2xf32, #tpu.memory_space<smem>>
    %141 = vector.broadcast %140 : f32 to vector<1x8xf32>
    %142 = arith.mulf %68, %141 : vector<1x8xf32>
    %143 = arith.addf %139, %142 : vector<1x8xf32>
    %c2_55 = arith.constant 2 : index
    %c0_56 = arith.constant 0 : index
    %144 = memref.load %arg3[%c2_55, %c0_56] : memref<4x2xf32, #tpu.memory_space<smem>>
    %145 = vector.broadcast %144 : f32 to vector<1x8xf32>
    %146 = arith.mulf %102, %145 : vector<1x8xf32>
    %147 = arith.addf %143, %146 : vector<1x8xf32>
    %c3_57 = arith.constant 3 : index
    %c0_58 = arith.constant 0 : index
    %148 = memref.load %arg3[%c3_57, %c0_58] : memref<4x2xf32, #tpu.memory_space<smem>>
    %149 = vector.broadcast %148 : f32 to vector<1x8xf32>
    %150 = arith.mulf %136, %149 : vector<1x8xf32>
    %151 = arith.addf %147, %150 : vector<1x8xf32>
    %c0_59 = arith.constant 0 : index
    %152 = memref.load %arg4[%c0_59] : memref<2xf32, #tpu.memory_space<smem>>
    %153 = vector.broadcast %152 : f32 to vector<1x8xf32>
    %154 = arith.addf %151, %153 : vector<1x8xf32>
    %c0_60 = arith.constant 0 : index
    %c1_61 = arith.constant 1 : index
    %155 = memref.load %arg3[%c0_60, %c1_61] : memref<4x2xf32, #tpu.memory_space<smem>>
    %156 = vector.broadcast %155 : f32 to vector<1x8xf32>
    %157 = arith.mulf %34, %156 : vector<1x8xf32>
    %c1_62 = arith.constant 1 : index
    %c1_63 = arith.constant 1 : index
    %158 = memref.load %arg3[%c1_62, %c1_63] : memref<4x2xf32, #tpu.memory_space<smem>>
    %159 = vector.broadcast %158 : f32 to vector<1x8xf32>
    %160 = arith.mulf %68, %159 : vector<1x8xf32>
    %161 = arith.addf %157, %160 : vector<1x8xf32>
    %c2_64 = arith.constant 2 : index
    %c1_65 = arith.constant 1 : index
    %162 = memref.load %arg3[%c2_64, %c1_65] : memref<4x2xf32, #tpu.memory_space<smem>>
    %163 = vector.broadcast %162 : f32 to vector<1x8xf32>
    %164 = arith.mulf %102, %163 : vector<1x8xf32>
    %165 = arith.addf %161, %164 : vector<1x8xf32>
    %c3_66 = arith.constant 3 : index
    %c1_67 = arith.constant 1 : index
    %166 = memref.load %arg3[%c3_66, %c1_67] : memref<4x2xf32, #tpu.memory_space<smem>>
    %167 = vector.broadcast %166 : f32 to vector<1x8xf32>
    %168 = arith.mulf %136, %167 : vector<1x8xf32>
    %169 = arith.addf %165, %168 : vector<1x8xf32>
    %c1_68 = arith.constant 1 : index
    %170 = memref.load %arg4[%c1_68] : memref<2xf32, #tpu.memory_space<smem>>
    %171 = vector.broadcast %170 : f32 to vector<1x8xf32>
    %172 = arith.addf %169, %171 : vector<1x8xf32>
    %173 = arith.maximumf %154, %172 : vector<1x8xf32>
    %174 = arith.subf %154, %173 : vector<1x8xf32>
    %175 = math.exp %174 : vector<1x8xf32>
    %176 = arith.subf %172, %173 : vector<1x8xf32>
    %177 = math.exp %176 : vector<1x8xf32>
    %178 = arith.addf %175, %177 : vector<1x8xf32>
    %cst_69 = arith.constant 1.000000e+00 : f32
    %179 = vector.broadcast %cst_69 : f32 to vector<1x8xf32>
    %180 = arith.divf %179, %178 : vector<1x8xf32>
    %181 = arith.mulf %175, %180 : vector<1x8xf32>
    %c0_70 = arith.constant 0 : index
    %c0_71 = arith.constant 0 : index
    %182 = vector.load %arg6[%c0_70, %c0_71] : memref<2x8xf32, #tpu.memory_space<vmem>>, vector<1x8xf32>
    tpu.vector_store %arg6[%c0_70, %c0_71], %181 {strides = array<i32>} : memref<2x8xf32, #tpu.memory_space<vmem>>, vector<1x8xf32>,
    %183 = arith.mulf %177, %180 : vector<1x8xf32>
    %c1_72 = arith.constant 1 : index
    %c0_73 = arith.constant 0 : index
    %184 = vector.load %arg6[%c1_72, %c0_73] : memref<2x8xf32, #tpu.memory_space<vmem>>, vector<1x8xf32>
    tpu.vector_store %arg6[%c1_72, %c0_73], %183 {strides = array<i32>} : memref<2x8xf32, #tpu.memory_space<vmem>>, vector<1x8xf32>,
    return
  }
  func.func @transform_0(%arg0: i32) -> (i32, i32) {
    %c0_i32 = arith.constant 0 : i32
    %c0_i32_0 = arith.constant 0 : i32
    %c0_i32_1 = arith.constant 0 : i32
    return %c0_i32, %c0_i32_0 : i32, i32
  }
  func.func @transform_1(%arg0: i32) -> i32 {
    %c0_i32 = arith.constant 0 : i32
    %c0_i32_0 = arith.constant 0 : i32
    return %c0_i32 : i32
  }
  func.func @transform_2(%arg0: i32) -> (i32, i32) {
    %c0_i32 = arith.constant 0 : i32
    %c0_i32_0 = arith.constant 0 : i32
    %c0_i32_1 = arith.constant 0 : i32
    return %c0_i32, %c0_i32_0 : i32, i32
  }
  func.func @transform_3(%arg0: i32) -> i32 {
    %c0_i32 = arith.constant 0 : i32
    %c0_i32_0 = arith.constant 0 : i32
    return %c0_i32 : i32
  }
  func.func @transform_4(%arg0: i32) -> (i32, i32) {
    %c0_i32 = arith.constant 0 : i32
    %c0_i32_0 = arith.constant 0 : i32
    return %c0_i32, %arg0 : i32, i32
  }
  func.func @transform_5(%arg0: i32) -> (i32, i32) {
    %c0_i32 = arith.constant 0 : i32
    %c0_i32_0 = arith.constant 0 : i32
    return %c0_i32, %arg0 : i32, i32
  }
}

</mosaic_0001>

<bundles_post_ra>
// kernel: meta_learner_forward.1
= control target key start
LH: loop header
LB: loop body
LE: loop exit
PB: predicated region body
PF: predicated region fallthrough
CT: control target
= control target key end

     0   :  { %10 = vsyncpa [#allocation4], 0  ;;  %s601_s0 = inlined_call_operand.vmem [shape: f32[6,4], index: 0, kind: input, shape index: {}]   ;;  %s602_s1 = inlined_call_operand.vmem [shape: f32[4], index: 1, kind: input, shape index: {}]   ;;  %s603_s2 = inlined_call_operand.vmem [shape: f32[4,2], index: 2, kind: input, shape index: {}]   ;;  %s604_s3 = inlined_call_operand.vmem [shape: f32[2], index: 3, kind: input, shape index: {}]   ;;  %s605_s4 = inlined_call_operand.vmem [shape: f32[6,8], index: 4, kind: input, shape index: {}]   ;;  %s606_s5 = inlined_call_operand.hbm [shape: f32[2,8], index: 5, kind: output, shape index: {}]  }
   0x1   :  { %11 = vsyncpa [#allocation6], 0 }
   0x2   :  { %12 = vsyncpa [#allocation9], 0  ;;  %s30_s20 = sshll.u32 %s602_s1, 4  ;;  %s31_s20 = int_to_ptr.vmem [resolvable:$true] %s30_s20 }
   0x3   :  { %13 = vsyncpa [#allocation3], 0  ;;  %s20_s23 = sshll.u32 %s601_s0, 4  ;;  %s351_s24 = scalar_lea.vmem %s31_s20, 16  ;;  %s21_s23 = int_to_ptr.vmem [resolvable:$true] %s20_s23 }
   0x4   :  { %p352_p0 = scmp.ne.s32.totalorder %s31_s20, %s351_s24  ;;  %p356_p1 = scmp.lt.s32.totalorder %s31_s20, %s31_s20 }
   0x5   :  { %p357_p2 = scmp.lt.s32.totalorder %s351_s24, %s351_s24 }
   0x7   :  { %p358_p3 = por %p357_p2, %p356_p1 }
   0x9   :  { %p359_p4 = pnand %p358_p3, %p352_p0 }
   0xb   :  { %362 = shalt.err (!%p359_p4)
}
   0xc   :  { %s429_s25 = smov [#allocation5]   ;;  %s363_s26 = scalar_lea.vmem %s21_s23, 128 }
   0xd   :  { %33 = dma.vmem_to_smem %s31_s20, 16, %s429_s25, [#allocation6]  }
   0xe   :  { %p364_p5 = scmp.ne.s32.totalorder %s21_s23, %s363_s26  ;;  %p368_p6 = scmp.lt.s32.totalorder %s21_s23, %s21_s23 }
   0xf   :  { %p369_p7 = scmp.lt.s32.totalorder %s363_s26, %s363_s26 }
  0x11   :  { %p370_p8 = por %p369_p7, %p368_p6 }
  0x13   :  { %p371_p9 = pnand %p370_p8, %p364_p5 }
  0x15   :  { %374 = shalt.err (!%p371_p9)
}
  0x16   :  { %s430_s1 = smov [#allocation2]   ;;  %s40_s28 = sshll.u32 %s603_s2, 4  ;;  %s41_s28 = int_to_ptr.vmem [resolvable:$true] %s40_s28 }
  0x17   :  { %23 = dma.vmem_to_smem %s21_s23, 128, %s430_s1, [#allocation4]  }
  0x18   :  { %s50_s6 = sshll.u32 %s604_s3, 4  ;;  %s375_s7 = scalar_lea.vmem %s41_s28, 64  ;;  %s51_s6 = int_to_ptr.vmem [resolvable:$true] %s50_s6 }
  0x19   :  { %p376_p10 = scmp.ne.s32.totalorder %s41_s28, %s375_s7  ;;  %p380_p11 = scmp.lt.s32.totalorder %s41_s28, %s41_s28 }
  0x1a   :  { %p381_p12 = scmp.lt.s32.totalorder %s375_s7, %s375_s7 }
  0x1c   :  { %p382_p13 = por %p381_p12, %p380_p11 }
  0x1e   :  { %p383_p0 = pnand %p382_p13, %p376_p10 }
  0x20   :  { %386 = shalt.err (!%p383_p0)
}
  0x21   :  { %s431_s8 = smov [#allocation7]   ;;  %s387_s9 = scalar_lea.vmem %s51_s6, 16 }
  0x22   :  { %43 = dma.vmem_to_smem %s41_s28, 64, %s431_s8, [#allocation6]  }
  0x23   :  { %p388_p1 = scmp.ne.s32.totalorder %s51_s6, %s387_s9  ;;  %p392_p2 = scmp.lt.s32.totalorder %s51_s6, %s51_s6 }
  0x24   :  { %p393_p3 = scmp.lt.s32.totalorder %s387_s9, %s387_s9 }
  0x26   :  { %p394_p4 = por %p393_p3, %p392_p2 }
  0x28   :  { %p395_p5 = pnand %p394_p4, %p388_p1 }
  0x2a   :  { %398 = shalt.err (!%p395_p5)
}
  0x2b   :  { %s432_s2 = smov [#allocation8]  }
  0x2c   :  { %53 = dma.vmem_to_smem %s51_s6, 16, %s432_s2, [#allocation9]  }
  0x2d   :  { %421 = dma.done.wait [#allocation4], 128  }
  0x2e   :  { %422 = vsyncadd [#allocation4], 4294967168 }
  0x2f   :  { %423 = dma.done.wait [#allocation6], 80  }
  0x30   :  { %424 = vsyncadd [#allocation6], 4294967216 }
  0x31   :  { %425 = dma.done.wait [#allocation9], 16  }
  0x32   :  { %426 = vsyncadd [#allocation9], 4294967280 }
  0x33   :  { %68 = sfence }
  0x34   :  { %s70_s3 = sld [smem:[#allocation2]]  ;;  %s478_s16 = sld [smem:[#allocation2 + $0x1]]  ;;  %v483_v0 = vld [vmem:[%s605_s4] sm:$0x3f]  ;;  %vm285_vm0 = vcmask 57344  }
  0x35   :  { %s306_s10 = sld [smem:[#allocation2 + $0x80]]  ;;  %s485_s19 = sld [smem:[#allocation2 + $0x81]] }
  0x36   :  { %s307_s11 = sld [smem:[#allocation2 + $0x100]]  ;;  %s487_s20 = sld [smem:[#allocation2 + $0x101]] }
  0x37   :  { %s308_s12 = sld [smem:[#allocation2 + $0x180]]  ;;  %s489_s21 = sld [smem:[#allocation2 + $0x181]] }
  0x38   :  { %s309_s13 = sld [smem:[#allocation2 + $0x200]]  ;;  %s491_s22 = sld [smem:[#allocation2 + $0x201]] }
  0x39   :  { %s310_s14 = sld [smem:[#allocation2 + $0x280]]  ;;  %s493_s23 = sld [smem:[#allocation2 + $0x281]] }
  0x3a   :  { %s476_s15 = sld [smem:[#allocation5]]  ;;  %v71_v1 = vstv %s70_s3  ;;  %s497_s4 = sld [smem:[#allocation2 + $0x2]]  ;;  %v113_v15 = vstv %s478_s16 }
  0x3b   :  { %v74_v2 = vstv %s306_s10  ;;  %v72_v3 = vmul.f32 %v71_v1, %v483_v0  ;;  %s501_s24 = sld [smem:[#allocation2 + $0x82]]  ;;  %v116_v16 = vstv %s485_s19  ;;  %v114_v20 = vmul.f32 %v113_v15, %v483_v0  ;;  %s523_s27 = sld [smem:[#allocation5 + $0x1]] }
  0x3c   :  { %v75_v4 = vmul.f32 %v74_v2, %v483_v0  ;;  %v81_v5 = vstv %s307_s11  ;;  %s504_s25 = sld [smem:[#allocation2 + $0x102]]  ;;  %v117_v21 = vmul.f32 %v116_v16, %v483_v0  ;;  %v123_v22 = vstv %s487_s20  ;;  %s528_s28 = sld [smem:[#allocation2 + $0x3]] }
  0x3d   :  { %v88_v6 = vstv %s308_s12  ;;  %v82_v7 = vmul.f32 %v81_v5, %v483_v0  ;;  %s506_s26 = sld [smem:[#allocation2 + $0x182]]  ;;  %v130_v23 = vstv %s489_s21  ;;  %v124_v27 = vmul.f32 %v123_v22, %v483_v0  ;;  %s530_s29 = sld [smem:[#allocation2 + $0x83]] }
  0x3e   :  { %v89_v8 = vmul.f32 %v88_v6, %v483_v0  ;;  %v95_v9 = vstv %s309_s13  ;;  %v77_v11 = vrot.slane %v75_v4, 1  ;;  %s513_s1 = sld [smem:[#allocation2 + $0x202]]  ;;  %v137_v24 = vstv %s491_s22  ;;  %s535_s30 = sld [smem:[#allocation2 + $0x103]] }
  0x3f   :  { %v102_v10 = vstv %s310_s14  ;;  %v96_v12 = vmul.f32 %v95_v9, %v483_v0  ;;  %v84_v13 = vrot.slane %v82_v7, 2  ;;  %s515_s0 = sld [smem:[#allocation2 + $0x282]]  ;;  %v131_v28 = vmul.f32 %v130_v23, %v483_v0  ;;  %s537_s6 = sld [smem:[#allocation2 + $0x183]] }
  0x40   :  { %v103_v14 = vmul.f32 %v102_v10, %v483_v0  ;;  %v79_v17 = vadd.f32 %v77_v11, %v72_v3  ;;  %v91_v18 = vrot.slane %v89_v8, 3  ;;  %v109_v19 = vstv %s476_s15  ;;  %s542_s7 = sld [smem:[#allocation2 + $0x203]]  ;;  %s550_s9 = sld [smem:[#allocation5 + $0x2]] }
  0x41   :  { %v98_v26 = vrot.slane %v96_v12, 4  ;;  %v119_v29 = vrot.slane %v117_v21, 1  ;;  %v138_v30 = vmul.f32 %v137_v24, %v483_v0  ;;  %v144_v31 = vstv %s493_s23  ;;  %s546_s8 = sld [smem:[#allocation2 + $0x283]]  ;;  %s555_s2 = sld [smem:[#allocation7]] }
  0x42   :  { %v86_v25 = vadd.f32 %v84_v13, %v79_v17  ;;  %v155_v32 = vstv %s497_s4  ;;  %v105_v34 = vrot.slane %v103_v14, 5  ;;  %v126_v35 = vrot.slane %v124_v27, 2  ;;  %s557_s3 = sld [smem:[#allocation7 + $0x80]]  ;;  %s562_s10 = sld [smem:[#allocation7 + $0x1]] }
  0x43   :  { %v133_v36 = vrot.slane %v131_v28, 3  ;;  %v121_v37 = vadd.f32 %v119_v29, %v114_v20  ;;  %v145_v38 = vmul.f32 %v144_v31, %v483_v0  ;;  %v156_v39 = vmul.f32 %v155_v32, %v483_v0  ;;  %s567_s11 = sld [smem:[#allocation7 + $0x81]]  ;;  %s572_s12 = sld [smem:[#allocation7 + $0x100]] }
  0x44   :  { %v93_v33 = vadd.f32 %v91_v18, %v86_v25  ;;  %v158_v40 = vstv %s501_s24  ;;  %v165_v43 = vstv %s504_s25  ;;  %v172_v44 = vstv %s506_s26  ;;  %s574_s13 = sld [smem:[#allocation7 + $0x101]]  ;;  %s579_s14 = sld [smem:[#allocation5 + $0x3]] }
  0x45   :  { %v159_v42 = vmul.f32 %v158_v40, %v483_v0  ;;  %v128_v45 = vadd.f32 %v126_v35, %v121_v37  ;;  %v140_v46 = vrot.slane %v138_v30, 4  ;;  %v166_v47 = vmul.f32 %v165_v43, %v483_v0  ;;  %s334_s15 = sld [smem:[#allocation7 + $0x180]]  ;;  %s338_s16 = sld [smem:[#allocation7 + $0x181]] }
  0x46   :  { %v100_v41 = vadd.f32 %v98_v26, %v93_v33  ;;  %v173_v48 = vmul.f32 %v172_v44, %v483_v0  ;;  %v179_v51 = vstv %s513_s1  ;;  %v186_v52 = vstv %s515_s0  ;;  %s253_s17 = sld [smem:[#allocation8]]  ;;  %s339_s18 = sld [smem:[#allocation8 + $0x1]] }
  0x47   :  { %v161_v50 = vrot.slane %v159_v42, 1  ;;  %v135_v53 = vadd.f32 %v133_v36, %v128_v45  ;;  %v147_v54 = vrot.slane %v145_v38, 5  ;;  %v168_v55 = vrot.slane %v166_v47, 2  ;;  %s433_s19 = smov [#allocation10]  }
  0x48   :  { %v107_v49 = vadd.f32 %v105_v34, %v100_v41  ;;  %v180_v56 = vmul.f32 %v179_v51, %v483_v0  ;;  %v151_v57 = vstv %s523_s27  ;;  %v175_v59 = vrot.slane %v173_v48, 3  ;;  %s295_s20 = sshll.u32 %s433_s19, 4  ;;  %s296_s20 = int_to_ptr.vmem [resolvable:$true] %s295_s20 }
  0x49   :  { %v163_v58 = vadd.f32 %v161_v50, %v156_v39  ;;  %v187_v60 = vmul.f32 %v186_v52, %v483_v0  ;;  %v142_v62 = vadd.f32 %v140_v46, %v135_v53  ;;  %v197_v63 = vstv %s528_s28  ;;  %s399_s21 = scalar_lea.vmem %s296_s20, 32  ;;  %p404_p7 = scmp.lt.s32.totalorder %s296_s20, %s296_s20 }
  0x4a   :  { %v110_v61 = vadd.f32 %v109_v19, %v107_v49  ;;  %v200_v1 = vstv %s530_s29  ;;  %v182_v3 = vrot.slane %v180_v56, 4  ;;  %v198_v5 = vmul.f32 %v197_v63, %v483_v0  ;;  %p400_p6 = scmp.ne.s32.totalorder %s296_s20, %s399_s21  ;;  %p405_p8 = scmp.lt.s32.totalorder %s399_s21, %s399_s21 }
  0x4b   :  { %v170_v2 = vadd.f32 %v168_v55, %v163_v58  ;;  %v189_v4 = vrot.slane %v187_v60, 5  ;;  %v149_v6 = vadd.f32 %v147_v54, %v142_v62  ;;  %v201_v7 = vmul.f32 %v200_v1, %v483_v0 }
  0x4c   :  { %v207_v8 = vstv %s535_s30  ;;  %v214_v9 = vstv %s537_s6  ;;  %v221_v13 = vstv %s542_s7  ;;  %v228_v17 = vstv %s546_s8  ;;  %p406_p9 = por %p405_p8, %p404_p7 }
  0x4d   :  { %v177_v10 = vadd.f32 %v175_v59, %v170_v2  ;;  %v208_v11 = vmul.f32 %v207_v8, %v483_v0  ;;  %v215_v12 = vmul.f32 %v214_v9, %v483_v0  ;;  %v152_v14 = vadd.f32 %v151_v57, %v149_v6 }
  0x4e   :  { %v203_v15 = vrot.slane %v201_v7, 1  ;;  %v222_v16 = vmul.f32 %v221_v13, %v483_v0  ;;  %v111_v18 = vmax.f32 %v110_v61, 0.0  ;;  %v193_v20 = vstv %s550_s9  ;;  %p407_p10 = pnand %p406_p9, %p400_p6 }
  0x4f   :  { %v184_v19 = vadd.f32 %v182_v3, %v177_v10  ;;  %v210_v21 = vrot.slane %v208_v11, 2  ;;  %v153_v22 = vmax.f32 %v152_v14, 0.0  ;;  %v217_v24 = vrot.slane %v215_v12, 3 }
  0x50   :  { %v205_v23 = vadd.f32 %v203_v15, %v198_v5  ;;  %v229_v25 = vmul.f32 %v228_v17, %v483_v0  ;;  %v239_v27 = vstv %s555_s2  ;;  %v242_v28 = vstv %s557_s3 }
  0x51   :  { %v191_v26 = vadd.f32 %v189_v4, %v184_v19  ;;  %v224_v30 = vrot.slane %v222_v16, 4  ;;  %v240_v32 = vmul.f32 %v239_v27, %v111_v18  ;;  %v243_v33 = vmul.f32 %v242_v28, %v153_v22 }
  0x52   :  { %v212_v29 = vadd.f32 %v210_v21, %v205_v23  ;;  %v257_v34 = vstv %s562_s10  ;;  %v231_v36 = vrot.slane %v229_v25, 5  ;;  %v260_v38 = vstv %s567_s11 }
  0x53   :  { %v194_v31 = vadd.f32 %v193_v20, %v191_v26  ;;  %v258_v37 = vmul.f32 %v257_v34, %v111_v18  ;;  %v246_v0 = vstv %s572_s12  ;;  %v261_v40 = vmul.f32 %v260_v38, %v153_v22 }
  0x54   :  { %v219_v35 = vadd.f32 %v217_v24, %v212_v29  ;;  %v264_v41 = vstv %s574_s13  ;;  %v235_v43 = vstv %s579_s14  ;;  %v244_v44 = vadd.f32 %v243_v33, %v240_v32 }
  0x55   :  { %v195_v39 = vmax.f32 %v194_v31, 0.0  ;;  %v262_v47 = vadd.f32 %v261_v40, %v258_v37  ;;  %v250_v50 = vstv %s334_s15  ;;  %v268_v51 = vstv %s338_s16 }
  0x56   :  { %v226_v42 = vadd.f32 %v224_v30, %v219_v35  ;;  %v254_v57 = vstv %s253_s17  ;;  %v272_v58 = vstv %s339_s18 }
  0x57   :  { %v247_v46 = vmul.f32 %v246_v0, %v195_v39  ;;  %v265_v48 = vmul.f32 %v264_v41, %v195_v39 }
  0x58   :  { %v233_v45 = vadd.f32 %v231_v36, %v226_v42 }
  0x59   :  { %v248_v53 = vadd.f32 %v247_v46, %v244_v44  ;;  %v266_v54 = vadd.f32 %v265_v48, %v262_v47 }
  0x5a   :  { %v236_v49 = vadd.f32 %v235_v43, %v233_v45 }
  0x5c   :  { %v237_v52 = vmax.f32 %v236_v49, 0.0 }
  0x5e   :  { %v251_v55 = vmul.f32 %v250_v50, %v237_v52  ;;  %v269_v56 = vmul.f32 %v268_v51, %v237_v52 }
  0x60   :  { %v252_v59 = vadd.f32 %v251_v55, %v248_v53  ;;  %v270_v60 = vadd.f32 %v269_v56, %v266_v54 }
  0x62   :  { %v255_v61 = vadd.f32 %v254_v57, %v252_v59  ;;  %v273_v62 = vadd.f32 %v272_v58, %v270_v60 }
  0x64   :  { %v274_v63 = vmax.f32 %v255_v61, %v273_v62 }
  0x66   :  { %v275_v1 = vsub.f32 %v255_v61, %v274_v63  ;;  %v278_v2 = vsub.f32 %v273_v62, %v274_v63 }
  0x68   :  { %v276_v3 = vmul.f32 1.442695, %v275_v1  ;;  %v279_v4 = vmul.f32 1.442695, %v278_v2 }
  0x6a   :  { %345 = vpow2.f32 %v276_v3 }
  0x6b   :  { %347 = vpow2.f32 %v279_v4 }
  0x74   :  { %v346_v5 = vpop.eup %345 }
  0x75   :  { %v348_v6 = vpop.eup %347 }
  0x76   :  { %v281_v7 = vadd.f32 %v348_v6, %v346_v5 }
  0x78   :  { %349 = vrcp.f32 %v281_v7 }
  0x82   :  { %v350_v8 = vpop.eup %349 }
  0x83   :  { %v284_v9 = vmul.f32 %v350_v8, %v346_v5  ;;  %v287_v10 = vmul.f32 %v350_v8, %v348_v6 }
  0x85   :  { %286 = vst.msk [vmem:[#allocation10] sm:$0x1] %vm285_vm0, %v284_v9  ;;  %288 = vst.msk [vmem:[#allocation10 + $0x1] sm:$0x1] %vm285_vm0, %v287_v10 }
  0x86   :  { %410 = shalt.err (!%p407_p10)
}
  0x87   :  { %s411_s4 = scalar_lea.hbm %s606_s5, 32 }
  0x88   :  { %p412_p11 = scmp.ne.s32.totalorder %s606_s5, %s411_s4  ;;  %p415_p12 = scmp.lt.u32.totalorder %s411_s4, %s606_s5 }
  0x8a   :  { %p417_p13 = pnand %p415_p12, %p412_p11 }
  0x8c   :  { %420 = shalt.err (!%p417_p13)
}
  0x8d   :  { %298 = dma.vmem_to_hbm [thread:$0]  %s296_s20, 32, %s606_s5, [#allocation3]  }
  0x8e   :  { %427 = dma.done.wait [#allocation3], 32  }
  0x8f   :  { %428 = vsyncadd [#allocation3], 4294967264 }
  0x90   :  { %302 = vsyncpa [#allocation3], 1 }
  0x91   :  { %303 = vsyncpa [#allocation4], 1 }
  0x92   :  { %304 = vsyncpa [#allocation6], 1 }
  0x93   :  { %305 = vsyncpa [#allocation9], 1 }

</bundles_post_ra>
